<compile_context>
chip_gen: v7x
topology: tpu7x:2x2x1
jax: 0.10.0
libtpu: 0.0.40
codegen_flags: <defaults>
</compile_context>

<pallas_src>
import functools

import jax
import jax.numpy as jnp
from jax.experimental import pallas as pl
from jax.experimental.pallas import tpu as pltpu

HIDDEN = 16
LANE = 128          # padded action width used only for in-VMEM logits/softmax math
NEG_BIG = -1e30     # f32-safe bias for padded action columns -> exp() underflows to 0


def policy_net_kernel(x_ref, w1t_ref, b1_ref, w2t_ref, b2_ref, o_ref):
    # x:   [tb, obs_dim]   w1t: [obs_dim, 16]   b1: [1, 16]
    # w2t: [16, 128]       b2:  [1, 128]        o:  [tb, n_act]
    x = x_ref[...]

    # fc1 + ReLU (MXU + VPU)
    h = jnp.dot(x, w1t_ref[...], preferred_element_type=jnp.float32) + b1_ref[...]
    h = jnp.maximum(h, 0.0)

    # fc2: lane-dense padded logits [tb, 128] (MXU). Padded columns carry a
    # -1e30 bias so they never win the max and add exp(...) == 0 to the sum.
    logits = (jnp.dot(h, w2t_ref[...], preferred_element_type=jnp.float32)
              + b2_ref[...])

    # Numerically stable softmax over the lane-dense padded logits.
    m = jnp.max(logits, axis=-1, keepdims=True)
    e = jnp.exp(logits - m)
    denom = jnp.sum(e, axis=-1, keepdims=True)
    inv = pl.reciprocal(denom, approx=False)   # exact: kernel is mem-bound anyway

    # Narrow store: only the real n_act columns go back to HBM.
    n_act = o_ref.shape[-1]
    o_ref[...] = (e * inv)[:, :n_act]


def prepare_params(w1, b1, w2, b2):
    """One-time conversion from PyTorch nn.Linear layout to kernel layout.

    w1: [16, obs_dim], b1: [16], w2: [n_act, 16], b2: [n_act].
    Call once at init / after each optimizer step — NOT per inference call.
    """
    n_act = int(w2.shape[0])
    assert n_act <= LANE
    w1t = jnp.asarray(w1, jnp.float32).T                        # [obs_dim, 16]
    b1r = jnp.asarray(b1, jnp.float32).reshape(1, HIDDEN)       # [1, 16]
    w2t = jnp.zeros((HIDDEN, LANE), jnp.float32).at[:, :n_act].set(
        jnp.asarray(w2, jnp.float32).T)                         # [16, 128]
    b2r = jnp.full((1, LANE), NEG_BIG, jnp.float32).at[0, :n_act].set(
        jnp.asarray(b2, jnp.float32))                           # [1, 128]
    return (w1t, b1r, w2t, b2r), n_act


def _round_up(x, m):
    return (x + m - 1) // m * m


@functools.partial(jax.jit, static_argnames=("n_act", "block_b"))
def policy_net_forward(x, params, *, n_act, block_b=None):
    """x: [B, obs_dim] f32; params from prepare_params(). Returns [B, n_act]."""
    w1t, b1r, w2t, b2r = params
    B, obs_dim = x.shape

    if block_b is None:
        # Large tiles to amortize per-step overhead, but keep >= 2 grid steps so
        # the "parallel" batch axis shards across both v7x TensorCores; cap at
        # 4096 rows for VMEM headroom (v5e default 16 MiB scoped, v7x 64 MiB phys).
        tb = _round_up(pl.cdiv(B, 2), 8) if B > 8 else 8
        tb = min(tb, 4096)
    else:
        tb = _round_up(block_b, 8)
    tb = max(8, min(tb, _round_up(B, 8)))

    grid_b = pl.cdiv(B, tb)   # ragged tail via Pallas partial blocks (no jnp.pad copy)

    return pl.pallas_call(
        policy_net_kernel,
        out_shape=jax.ShapeDtypeStruct((B, n_act), jnp.float32),
        grid_spec=pltpu.PrefetchScalarGridSpec(
            num_scalar_prefetch=0,
            grid=(grid_b,),
            in_specs=[
                pl.BlockSpec((tb, obs_dim), lambda i: (i, 0)),      # x tiles
                pl.BlockSpec((obs_dim, HIDDEN), lambda i: (0, 0)),  # resident
                pl.BlockSpec((1, HIDDEN), lambda i: (0, 0)),        # resident
                pl.BlockSpec((HIDDEN, LANE), lambda i: (0, 0)),     # resident
                pl.BlockSpec((1, LANE), lambda i: (0, 0)),          # resident
            ],
            out_specs=pl.BlockSpec((tb, n_act), lambda i: (i, 0)),  # narrow output
        ),
        compiler_params=pltpu.CompilerParams(
            dimension_semantics=("parallel",),     # 2-TC sharding on v7x
            vmem_limit_bytes=32 << 20,
        ),
        cost_estimate=pl.CostEstimate(
            flops=2 * B * (obs_dim * HIDDEN + HIDDEN * LANE),
            transcendentals=B * LANE,
            bytes_accessed=4 * B * (obs_dim + n_act),
        ),
    )(x, w1t, b1r, w2t, b2r)


if __name__ == "__main__":
    # Synthetic env dims (CartPole-like): obs_dim=4, n_actions=2.
    B, OBS_DIM, N_ACT = 8, 4, 2

    key = jax.random.PRNGKey(0)
    k_x, k_w1, k_b1, k_w2, k_b2, k_x2 = jax.random.split(key, 6)

    # PyTorch-style uniform(-1/sqrt(fan_in), 1/sqrt(fan_in)) init.
    bound1 = 1.0 / (OBS_DIM ** 0.5)
    bound2 = 1.0 / (HIDDEN ** 0.5)
    w1 = jax.random.uniform(k_w1, (HIDDEN, OBS_DIM), jnp.float32, -bound1, bound1)
    b1 = jax.random.uniform(k_b1, (HIDDEN,), jnp.float32, -bound1, bound1)
    w2 = jax.random.uniform(k_w2, (N_ACT, HIDDEN), jnp.float32, -bound2, bound2)
    b2 = jax.random.uniform(k_b2, (N_ACT,), jnp.float32, -bound2, bound2)

    params, n_act = prepare_params(w1, b1, w2, b2)   # one-time glue, hoisted

    def ref_fn(xs):
        return jax.nn.softmax(
            jnp.maximum(xs @ w1.T + b1, 0.0) @ w2.T + b2, axis=-1)

    # Small single-tile batch.
    x = jax.random.normal(k_x, (B, OBS_DIM), jnp.float32)
    probs = jax.block_until_ready(policy_net_forward(x, params, n_act=n_act))
    assert probs.shape == (B, N_ACT)
    assert jnp.allclose(jnp.sum(probs, axis=-1), 1.0, atol=1e-5)
    assert jnp.allclose(probs, ref_fn(x), atol=1e-5)

    # Multi-tile batch with default tile choice (>=2 grid steps, ragged tail).
    B2 = 200
    x2 = jax.random.normal(k_x2, (B2, OBS_DIM), jnp.float32)
    probs2 = jax.block_until_ready(policy_net_forward(x2, params, n_act=n_act))
    assert probs2.shape == (B2, N_ACT)
    assert jnp.allclose(jnp.sum(probs2, axis=-1), 1.0, atol=1e-5)
    assert jnp.allclose(probs2, ref_fn(x2), atol=1e-5)

    # Explicit small block: exercises multiple grid steps + partial last block.
    probs3 = jax.block_until_ready(
        policy_net_forward(x2, params, n_act=n_act, block_b=64))
    assert probs3.shape == (B2, N_ACT)
    assert jnp.allclose(probs3, ref_fn(x2), atol=1e-5)

    print("KERNEL_OK")
</pallas_src>

<mosaic_0001>
module attributes {stable_mosaic.version = 11 : i64} {
  func.func @policy_net_kernel(%arg0: i32, %arg1: memref<8x4xf32, #tpu.memory_space<vmem>>, %arg2: memref<4x16xf32, #tpu.memory_space<vmem>>, %arg3: memref<1x16xf32, #tpu.memory_space<vmem>>, %arg4: memref<16x128xf32, #tpu.memory_space<vmem>>, %arg5: memref<1x128xf32, #tpu.memory_space<vmem>>, %arg6: memref<8x2xf32, #tpu.memory_space<vmem>>) attributes {dimension_semantics = [#tpu.dimension_semantics<parallel>], iteration_bounds = array<i64: 1>, scalar_prefetch = 0 : i64, scratch_operands = 0 : i64, tpu.core_type = #tpu.core_type<tc>, window_params = [{transform_indices = @transform_0, window_bounds = array<i64: 8, 4>}, {pipeline_mode = #tpu.pipeline_mode<synchronous>, transform_indices = @transform_1, window_bounds = array<i64: 4, 16>}, {pipeline_mode = #tpu.pipeline_mode<synchronous>, transform_indices = @transform_2, window_bounds = array<i64: 1, 16>}, {pipeline_mode = #tpu.pipeline_mode<synchronous>, transform_indices = @transform_3, window_bounds = array<i64: 16, 128>}, {pipeline_mode = #tpu.pipeline_mode<synchronous>, transform_indices = @transform_4, window_bounds = array<i64: 1, 128>}, {transform_indices = @transform_5, window_bounds = array<i64: 8, 2>}]} {
    %c0 = arith.constant 0 : index
    %c0_0 = arith.constant 0 : index
    %0 = vector.load %arg1[%c0, %c0_0] : memref<8x4xf32, #tpu.memory_space<vmem>>, vector<8x4xf32>
    %c0_1 = arith.constant 0 : index
    %c0_2 = arith.constant 0 : index
    %1 = vector.load %arg2[%c0_1, %c0_2] : memref<4x16xf32, #tpu.memory_space<vmem>>, vector<4x16xf32>
    %cst = arith.constant dense<0.000000e+00> : vector<8x16xf32>
    %2 = tpu.matmul %0, %1, %cst {dimension_numbers = #tpu.dot_dimension_numbers<[1], [0], [0], [1], [0, 0, 1, 1], [], []>} : vector<8x4xf32>, vector<4x16xf32>, vector<8x16xf32> -> vector<8x16xf32>
    %c0_3 = arith.constant 0 : index
    %c0_4 = arith.constant 0 : index
    %3 = vector.load %arg3[%c0_3, %c0_4] : memref<1x16xf32, #tpu.memory_space<vmem>>, vector<1x16xf32>
    %4 = vector.broadcast %3 : vector<1x16xf32> to vector<8x16xf32>
    %5 = arith.addf %2, %4 : vector<8x16xf32>
    %cst_5 = arith.constant 0.000000e+00 : f32
    %6 = vector.broadcast %cst_5 : f32 to vector<8x16xf32>
    %7 = arith.maximumf %5, %6 : vector<8x16xf32>
    %c0_6 = arith.constant 0 : index
    %c0_7 = arith.constant 0 : index
    %8 = vector.load %arg4[%c0_6, %c0_7] : memref<16x128xf32, #tpu.memory_space<vmem>>, vector<16x128xf32>
    %cst_8 = arith.constant dense<0.000000e+00> : vector<8x128xf32>
    %9 = tpu.matmul %7, %8, %cst_8 {dimension_numbers = #tpu.dot_dimension_numbers<[1], [0], [0], [1], [0, 0, 1, 1], [], []>} : vector<8x16xf32>, vector<16x128xf32>, vector<8x128xf32> -> vector<8x128xf32>
    %c0_9 = arith.constant 0 : index
    %c0_10 = arith.constant 0 : index
    %10 = vector.load %arg5[%c0_9, %c0_10] : memref<1x128xf32, #tpu.memory_space<vmem>>, vector<1x128xf32>
    %11 = vector.broadcast %10 : vector<1x128xf32> to vector<8x128xf32>
    %12 = arith.addf %9, %11 : vector<8x128xf32>
    %cst_11 = arith.constant dense<0xFF800000> : vector<8xf32>
    %13 = vector.multi_reduction <maximumf>, %12, %cst_11 [1] : vector<8x128xf32> to vector<8xf32>
    %14 = vector.shape_cast %13 : vector<8xf32> to vector<8x1xf32>
    %15 = vector.broadcast %14 : vector<8x1xf32> to vector<8x128xf32>
    %16 = arith.subf %12, %15 : vector<8x128xf32>
    %17 = math.exp %16 : vector<8x128xf32>
    %cst_12 = arith.constant dense<0.000000e+00> : vector<8xf32>
    %18 = vector.multi_reduction <add>, %17, %cst_12 [1] : vector<8x128xf32> to vector<8xf32>
    %19 = vector.shape_cast %18 : vector<8xf32> to vector<8x1xf32>
    %20 = tpu.reciprocal %19 : vector<8x1xf32> -> vector<8x1xf32>
    %21 = vector.broadcast %20 : vector<8x1xf32> to vector<8x128xf32>
    %22 = arith.mulf %17, %21 : vector<8x128xf32>
    %23 = vector.extract_strided_slice %22 {offsets = [0, 0], sizes = [8, 2], strides = [1, 1]} : vector<8x128xf32> to vector<8x2xf32>
    %c0_13 = arith.constant 0 : index
    %c0_14 = arith.constant 0 : index
    %24 = vector.load %arg6[%c0_13, %c0_14] : memref<8x2xf32, #tpu.memory_space<vmem>>, vector<8x2xf32>
    tpu.vector_store %arg6[%c0_13, %c0_14], %23 {strides = array<i32>} : memref<8x2xf32, #tpu.memory_space<vmem>>, vector<8x2xf32>,
    return
  }
  func.func @transform_0(%arg0: i32) -> (i32, i32) {
    %c0_i32 = arith.constant 0 : i32
    %c0_i32_0 = arith.constant 0 : i32
    return %arg0, %c0_i32 : i32, i32
  }
  func.func @transform_1(%arg0: i32) -> (i32, i32) {
    %c0_i32 = arith.constant 0 : i32
    %c0_i32_0 = arith.constant 0 : i32
    %c0_i32_1 = arith.constant 0 : i32
    return %c0_i32, %c0_i32_0 : i32, i32
  }
  func.func @transform_2(%arg0: i32) -> (i32, i32) {
    %c0_i32 = arith.constant 0 : i32
    %c0_i32_0 = arith.constant 0 : i32
    %c0_i32_1 = arith.constant 0 : i32
    return %c0_i32, %c0_i32_0 : i32, i32
  }
  func.func @transform_3(%arg0: i32) -> (i32, i32) {
    %c0_i32 = arith.constant 0 : i32
    %c0_i32_0 = arith.constant 0 : i32
    %c0_i32_1 = arith.constant 0 : i32
    return %c0_i32, %c0_i32_0 : i32, i32
  }
  func.func @transform_4(%arg0: i32) -> (i32, i32) {
    %c0_i32 = arith.constant 0 : i32
    %c0_i32_0 = arith.constant 0 : i32
    %c0_i32_1 = arith.constant 0 : i32
    return %c0_i32, %c0_i32_0 : i32, i32
  }
  func.func @transform_5(%arg0: i32) -> (i32, i32) {
    %c0_i32 = arith.constant 0 : i32
    %c0_i32_0 = arith.constant 0 : i32
    return %arg0, %c0_i32 : i32, i32
  }
}

</mosaic_0001>

<bundles_post_ra>
// kernel: policy_net_forward.1
= control target key start
LH: loop header
LB: loop body
LE: loop exit
PB: predicated region body
PF: predicated region fallthrough
CT: control target
= control target key end

     0   :  { %vm33_vm0 = vcmask 1043456   ;;  %vm29_vm1 = vcmask 31744   ;;  %v238_v0 = vmov 0.0   ;;  %vm239_vm2 = vmmov 0   ;;  %s292_s1 = inlined_call_operand.vmem [shape: f32[4,16], index: 1, kind: input, shape index: {}]   ;;  %s293_s0 = inlined_call_operand.vmem [shape: f32[8,4], index: 0, kind: input, shape index: {}]   ;;  %s294_s3 = inlined_call_operand.vmem [shape: f32[16,128], index: 3, kind: input, shape index: {}]   ;;  %s295_s2 = inlined_call_operand.vmem [shape: f32[1,16], index: 2, kind: input, shape index: {}]   ;;  %s296_s4 = inlined_call_operand.vmem [shape: f32[1,128], index: 4, kind: input, shape index: {}]   ;;  %s297_s5 = inlined_call_operand.vmem [shape: f32[8,2], index: 5, kind: output, shape index: {}]  }
   0x1   :  { %216 = vmatprep.subr.mxu0 %v238_v0  ;;  %v21_v1 = vld [vmem:[%s292_s1] sm:$0xf]  ;;  %218 = vmatprep.mubr.msk.f32.mxu0 %vm239_vm2, %v238_v0  ;;  %v109_v4 = vld [vmem:[%s294_s3 + $0x8] sm:$0xff]  ;;  %v240_v6 = vmov 0.0|0.0   ;;  %vm117_vm3 = vcmask 130048   ;;  %vm200_vm4 = vcmask 15360  }
   0x2   :  { %v20_v2 = vld [vmem:[%s293_s0] sm:$0xff]  ;;  %217 = vmatpush3.msk.msra.mxu0 %vm33_vm0, %v21_v1  ;;  %225 = vmatprep.mubr.msk.f32.mxu1 %vm239_vm2, %v238_v0 }
   0x3   :  { %219 = vmatmul.mubr.msk.f32.vlgmr.msra.gmra.mrb[0].mxu0 %vm29_vm1, %v20_v2  ;;  %v108_v3 = vld [vmem:[%s294_s3] sm:$0xff]  ;;  %228 = vmatprep.subr.bf16.mxu1 %v240_v6 }
   0x4   :  { %v229_v5 = vpack.c.bf16 %v109_v4, %v108_v3  ;;  %v206_v7 = vld [vmem:[%s295_s2] ss:$0 sm:$0xff] }
   0x5   :  { %v209_v12 = vld [vmem:[%s296_s4] ss:$0 sm:$0xff] }
   0x6   :  { %230 = vmatpush3.bf16.msra.mxu1 %v229_v5 }
  0xd6   :  { %v103_v8 = vpop.f32.mrb[0].mxu0 }
  0xd7   :  { %v104_v9 = vadd.f32 %v206_v7, %v103_v8  ;;  %v220_v10 = vpop.f32.mrb[1].mxu0 }
  0xd9   :  { %v107_v11 = vmax.f32 %v104_v9, 0.0 }
  0xdb   :  { %226 = vmatmul.mubr.msk.f32.vlgmr.msra.gmra.mrb[0].mxu1 %vm117_vm3, %v107_v11 }
 0x1ae   :  { %v187_v13 = vpop.f32.mrb[0].mxu1 }
 0x1af   :  { %v188_v14 = vadd.f32 %v209_v12, %v187_v13  ;;  %v227_v15 = vpop.f32.mrb[1].mxu1 }
 0x1b1   :  { %191 = vmax.xlane.f32.xlu0 %v188_v14 }
 0x23e   :  { %v192_v16 = vpop.xlane.xlu0 %191 }
 0x23f   :  { %v193_v17 = vsub.f32 %v188_v14, %v192_v16 }
 0x241   :  { %v194_v18 = vmul.f32 1.442695, %v193_v17 }
 0x243   :  { %234 = vpow2.f32 %v194_v18 }
 0x24d   :  { %v235_v19 = vpop.eup %234 }
 0x24e   :  { %196 = vadd.xlane.f32.xlu0 %v235_v19 }
 0x2db   :  { %v197_v20 = vpop.xlane.xlu0 %196 }
 0x2dc   :  { %236 = vrcp.f32 %v197_v20 }
 0x2e6   :  { %v237_v21 = vpop.eup %236 }
 0x2e7   :  { %v199_v22 = vmul.f32 %v237_v21, %v235_v19 }
 0x2e9   :  { %201 = vst.msk [vmem:[%s297_s5] sm:$0xff] %vm200_vm4, %v199_v22 }

</bundles_post_ra>
